<compile_context>
chip_gen: v7x
topology: tpu7x:2x2x1
jax: 0.10.0
libtpu: 0.0.40
codegen_flags: <defaults>
</compile_context>

<pallas_src>
import functools

import jax
import jax.numpy as jnp
from jax.experimental import pallas as pl
from jax.experimental.pallas import tpu as pltpu


def _fused_mlp_kernel(*refs, layer_sizes):
    """Full MLP forward on one activation row-tile.

    refs = (x_ref, w_0, ..., w_{L-1}, b_packed_ref, o_ref)
    layer_sizes = (in_features, hidden..., nb_classes)
    """
    n_layers = len(layer_sizes) - 1
    x_ref = refs[0]
    w_refs = refs[1 : 1 + n_layers]
    b_packed_ref = refs[1 + n_layers]
    o_ref = refs[2 + n_layers]

    b_all = b_packed_ref[...]  # (n_layers, max_out) -- loaded once per tile
    h = x_ref[...].astype(jnp.float32)
    for i in range(n_layers):
        out_i = layer_sizes[i + 1]
        # MXU matmul with f32 accumulation, then bias (+ ReLU except last layer).
        h = jnp.dot(h, w_refs[i][...], preferred_element_type=jnp.float32)
        h = h + b_all[i, :out_i]  # (out_i,) broadcasts over batch rows
        if i != n_layers - 1:
            h = jnp.maximum(h, 0.0)
    o_ref[...] = h.astype(o_ref.dtype)


def fused_mlp_forward(x, params, *, row_tile=512):
    """x: (N, in_features); params: list of (w:(in,out), b:(1,out)) -> (N, nb_classes)."""
    n_layers = len(params)
    batch, in_features = x.shape
    layer_sizes = (in_features,) + tuple(w.shape[1] for w, _ in params)
    nb_classes = layer_sizes[-1]
    max_out = max(layer_sizes[1:])
    dtype = x.dtype

    # Pack all biases into one (n_layers, max_out) input (single small DMA).
    b_packed = jnp.zeros((n_layers, max_out), dtype=dtype)
    for i, (_, b) in enumerate(params):
        b_packed = b_packed.at[i, : b.shape[-1]].set(b.reshape(-1).astype(dtype))

    # Batch tiling. A full-extent block is always legal, so small batches run
    # as a single grid step; large batches get row tiles of `row_tile` (a
    # multiple of 8 for sublane alignment), padding rows with zeros if needed.
    if batch <= row_tile:
        tile = batch
        padded_batch = batch
        x_in = x
    else:
        tile = row_tile
        padded_batch = pl.cdiv(batch, tile) * tile
        x_in = x if padded_batch == batch else jnp.pad(
            x, ((0, padded_batch - batch), (0, 0)))
    n_tiles = padded_batch // tile

    kernel = functools.partial(_fused_mlp_kernel, layer_sizes=layer_sizes)

    in_specs = [pl.BlockSpec((tile, in_features), lambda i: (i, 0))]
    for w, _ in params:
        in_specs.append(pl.BlockSpec(w.shape, lambda i: (0, 0)))  # weights resident
    in_specs.append(pl.BlockSpec(b_packed.shape, lambda i: (0, 0)))

    # Advisory cost estimate for the XLA scheduler.
    flops = 0
    for i in range(n_layers):
        flops += 2 * batch * layer_sizes[i] * layer_sizes[i + 1]  # matmul
        flops += batch * layer_sizes[i + 1]                        # bias
        if i != n_layers - 1:
            flops += batch * layer_sizes[i + 1]                    # relu
    itemsize = jnp.dtype(dtype).itemsize
    bytes_accessed = (
        x.size * itemsize
        + sum(w.size * itemsize for w, _ in params)
        + b_packed.size * itemsize
        + batch * nb_classes * itemsize
    )
    cost = pl.CostEstimate(flops=flops, transcendentals=0,
                           bytes_accessed=bytes_accessed)

    out = pl.pallas_call(
        kernel,
        out_shape=jax.ShapeDtypeStruct((padded_batch, nb_classes), dtype),
        grid=(n_tiles,),
        in_specs=in_specs,
        out_specs=pl.BlockSpec((tile, nb_classes), lambda i: (i, 0)),
        compiler_params=pltpu.CompilerParams(dimension_semantics=("parallel",)),
        cost_estimate=cost,
    )(x_in, *[w for w, _ in params], b_packed)

    if padded_batch != batch:
        out = out[:batch]
    return out


def init_mlp_params(key, in_features, hidden_sizes, nb_classes, dtype=jnp.float32):
    """PyTorch-style uniform(-1/sqrt(fan_in), 1/sqrt(fan_in)) init.

    Weights stored as (fan_in, fan_out) — already transposed for the kernel.
    """
    sizes = [in_features] + list(hidden_sizes) + [nb_classes]
    params = []
    for i in range(len(sizes) - 1):
        fan_in, fan_out = sizes[i], sizes[i + 1]
        key, kw, kb = jax.random.split(key, 3)
        bound = 1.0 / jnp.sqrt(jnp.asarray(fan_in, dtype))
        w = jax.random.uniform(kw, (fan_in, fan_out), dtype, -bound, bound)
        b = jax.random.uniform(kb, (1, fan_out), dtype, -bound, bound)
        params.append((w, b))
    return params


def nn_forward_ref(x, params):
    """Pure-JAX reference replicating NN.forward (Linear + ReLU stack)."""
    n_layers = len(params)
    for i, (w, b) in enumerate(params):
        x = x @ w + b
        if i != n_layers - 1:
            x = jnp.maximum(x, 0.0)
    return x


if __name__ == "__main__":
    # Small shapes consistent with the module: in_features=4, hidden=[32, 32],
    # nb_classes=2, batch=8.
    in_features = 4
    hidden_sizes = [32, 32]
    nb_classes = 2
    batch = 8

    key = jax.random.PRNGKey(0)
    key, kx = jax.random.split(key)
    x = jax.random.normal(kx, (batch, in_features), dtype=jnp.float32)
    params = init_mlp_params(key, in_features, hidden_sizes, nb_classes)

    fwd = jax.jit(lambda x: fused_mlp_forward(x, params))
    out = fwd(x)
    jax.block_until_ready(out)

    ref = nn_forward_ref(x, params)
    assert out.shape == (batch, nb_classes)
    assert jnp.allclose(out, ref, atol=1e-5, rtol=1e-5), "mismatch vs reference"

    # Also exercise the tiled (large-batch, non-divisible) path once.
    key, kx2 = jax.random.split(key)
    x_big = jax.random.normal(kx2, (1030, in_features), dtype=jnp.float32)
    out_big = jax.jit(lambda x: fused_mlp_forward(x, params))(x_big)
    jax.block_until_ready(out_big)
    assert out_big.shape == (1030, nb_classes)
    assert jnp.allclose(out_big, nn_forward_ref(x_big, params), atol=1e-5, rtol=1e-5)

    print("KERNEL_OK")
</pallas_src>

<mosaic_0001>
module attributes {stable_mosaic.version = 11 : i64} {
  func.func @_fused_mlp_kernel(%arg0: i32, %arg1: memref<8x4xf32, #tpu.memory_space<vmem>>, %arg2: memref<4x32xf32, #tpu.memory_space<vmem>>, %arg3: memref<32x32xf32, #tpu.memory_space<vmem>>, %arg4: memref<32x2xf32, #tpu.memory_space<vmem>>, %arg5: memref<3x32xf32, #tpu.memory_space<vmem>>, %arg6: memref<8x2xf32, #tpu.memory_space<vmem>>) attributes {dimension_semantics = [#tpu.dimension_semantics<parallel>], iteration_bounds = array<i64: 1>, scalar_prefetch = 0 : i64, scratch_operands = 0 : i64, tpu.core_type = #tpu.core_type<tc>, window_params = [{transform_indices = @transform_0, window_bounds = array<i64: 8, 4>}, {pipeline_mode = #tpu.pipeline_mode<synchronous>, transform_indices = @transform_1, window_bounds = array<i64: 4, 32>}, {pipeline_mode = #tpu.pipeline_mode<synchronous>, transform_indices = @transform_2, window_bounds = array<i64: 32, 32>}, {pipeline_mode = #tpu.pipeline_mode<synchronous>, transform_indices = @transform_3, window_bounds = array<i64: 32, 2>}, {pipeline_mode = #tpu.pipeline_mode<synchronous>, transform_indices = @transform_4, window_bounds = array<i64: 3, 32>}, {transform_indices = @transform_5, window_bounds = array<i64: 8, 2>}]} {
    %c0 = arith.constant 0 : index
    %c0_0 = arith.constant 0 : index
    %0 = vector.load %arg5[%c0, %c0_0] : memref<3x32xf32, #tpu.memory_space<vmem>>, vector<3x32xf32>
    %c0_1 = arith.constant 0 : index
    %c0_2 = arith.constant 0 : index
    %1 = vector.load %arg1[%c0_1, %c0_2] : memref<8x4xf32, #tpu.memory_space<vmem>>, vector<8x4xf32>
    %c0_3 = arith.constant 0 : index
    %c0_4 = arith.constant 0 : index
    %2 = vector.load %arg2[%c0_3, %c0_4] : memref<4x32xf32, #tpu.memory_space<vmem>>, vector<4x32xf32>
    %cst = arith.constant dense<0.000000e+00> : vector<8x32xf32>
    %3 = tpu.matmul %1, %2, %cst {dimension_numbers = #tpu.dot_dimension_numbers<[1], [0], [0], [1], [0, 0, 1, 1], [], []>} : vector<8x4xf32>, vector<4x32xf32>, vector<8x32xf32> -> vector<8x32xf32>
    %4 = vector.extract_strided_slice %0 {offsets = [0, 0], sizes = [1, 32], strides = [1, 1]} : vector<3x32xf32> to vector<1x32xf32>
    %5 = vector.shape_cast %4 : vector<1x32xf32> to vector<32xf32>
    %6 = vector.shape_cast %5 : vector<32xf32> to vector<1x32xf32>
    %7 = vector.broadcast %6 : vector<1x32xf32> to vector<8x32xf32>
    %8 = arith.addf %3, %7 : vector<8x32xf32>
    %cst_5 = arith.constant 0.000000e+00 : f32
    %9 = vector.broadcast %cst_5 : f32 to vector<8x32xf32>
    %10 = arith.maximumf %8, %9 : vector<8x32xf32>
    %c0_6 = arith.constant 0 : index
    %c0_7 = arith.constant 0 : index
    %11 = vector.load %arg3[%c0_6, %c0_7] : memref<32x32xf32, #tpu.memory_space<vmem>>, vector<32x32xf32>
    %cst_8 = arith.constant dense<0.000000e+00> : vector<8x32xf32>
    %12 = tpu.matmul %10, %11, %cst_8 {dimension_numbers = #tpu.dot_dimension_numbers<[1], [0], [0], [1], [0, 0, 1, 1], [], []>} : vector<8x32xf32>, vector<32x32xf32>, vector<8x32xf32> -> vector<8x32xf32>
    %13 = vector.extract_strided_slice %0 {offsets = [1, 0], sizes = [1, 32], strides = [1, 1]} : vector<3x32xf32> to vector<1x32xf32>
    %14 = vector.shape_cast %13 : vector<1x32xf32> to vector<32xf32>
    %15 = vector.shape_cast %14 : vector<32xf32> to vector<1x32xf32>
    %16 = vector.broadcast %15 : vector<1x32xf32> to vector<8x32xf32>
    %17 = arith.addf %12, %16 : vector<8x32xf32>
    %cst_9 = arith.constant 0.000000e+00 : f32
    %18 = vector.broadcast %cst_9 : f32 to vector<8x32xf32>
    %19 = arith.maximumf %17, %18 : vector<8x32xf32>
    %c0_10 = arith.constant 0 : index
    %c0_11 = arith.constant 0 : index
    %20 = vector.load %arg4[%c0_10, %c0_11] : memref<32x2xf32, #tpu.memory_space<vmem>>, vector<32x2xf32>
    %cst_12 = arith.constant dense<0.000000e+00> : vector<8x2xf32>
    %21 = tpu.matmul %19, %20, %cst_12 {dimension_numbers = #tpu.dot_dimension_numbers<[1], [0], [0], [1], [0, 0, 1, 1], [], []>} : vector<8x32xf32>, vector<32x2xf32>, vector<8x2xf32> -> vector<8x2xf32>
    %22 = vector.extract_strided_slice %0 {offsets = [2, 0], sizes = [1, 2], strides = [1, 1]} : vector<3x32xf32> to vector<1x2xf32>
    %23 = vector.shape_cast %22 : vector<1x2xf32> to vector<2xf32>
    %24 = vector.shape_cast %23 : vector<2xf32> to vector<1x2xf32>
    %25 = vector.broadcast %24 : vector<1x2xf32> to vector<8x2xf32>
    %26 = arith.addf %21, %25 : vector<8x2xf32>
    %c0_13 = arith.constant 0 : index
    %c0_14 = arith.constant 0 : index
    %27 = vector.load %arg6[%c0_13, %c0_14] : memref<8x2xf32, #tpu.memory_space<vmem>>, vector<8x2xf32>
    tpu.vector_store %arg6[%c0_13, %c0_14], %26 {strides = array<i32>} : memref<8x2xf32, #tpu.memory_space<vmem>>, vector<8x2xf32>,
    return
  }
  func.func @transform_0(%arg0: i32) -> (i32, i32) {
    %c0_i32 = arith.constant 0 : i32
    %c0_i32_0 = arith.constant 0 : i32
    return %arg0, %c0_i32 : i32, i32
  }
  func.func @transform_1(%arg0: i32) -> (i32, i32) {
    %c0_i32 = arith.constant 0 : i32
    %c0_i32_0 = arith.constant 0 : i32
    %c0_i32_1 = arith.constant 0 : i32
    return %c0_i32, %c0_i32_0 : i32, i32
  }
  func.func @transform_2(%arg0: i32) -> (i32, i32) {
    %c0_i32 = arith.constant 0 : i32
    %c0_i32_0 = arith.constant 0 : i32
    %c0_i32_1 = arith.constant 0 : i32
    return %c0_i32, %c0_i32_0 : i32, i32
  }
  func.func @transform_3(%arg0: i32) -> (i32, i32) {
    %c0_i32 = arith.constant 0 : i32
    %c0_i32_0 = arith.constant 0 : i32
    %c0_i32_1 = arith.constant 0 : i32
    return %c0_i32, %c0_i32_0 : i32, i32
  }
  func.func @transform_4(%arg0: i32) -> (i32, i32) {
    %c0_i32 = arith.constant 0 : i32
    %c0_i32_0 = arith.constant 0 : i32
    %c0_i32_1 = arith.constant 0 : i32
    return %c0_i32, %c0_i32_0 : i32, i32
  }
  func.func @transform_5(%arg0: i32) -> (i32, i32) {
    %c0_i32 = arith.constant 0 : i32
    %c0_i32_0 = arith.constant 0 : i32
    return %arg0, %c0_i32 : i32, i32
  }
}

</mosaic_0001>

<bundles_post_ra>
// kernel: _lambda_.1
= control target key start
LH: loop header
LB: loop body
LE: loop exit
PB: predicated region body
PF: predicated region fallthrough
CT: control target
= control target key end

     0   :  { %10 = vsyncpa [#allocation3], 0  ;;  %s489_s0 = inlined_call_operand.vmem [shape: f32[8,4], index: 0, kind: input, shape index: {}]   ;;  %s490_s1 = inlined_call_operand.vmem [shape: f32[4,32], index: 1, kind: input, shape index: {}]   ;;  %s491_s2 = inlined_call_operand.hbm [shape: f32[32,32], index: 2, kind: input, shape index: {}]   ;;  %s492_s3 = inlined_call_operand.hbm [shape: f32[32,2], index: 3, kind: input, shape index: {}]   ;;  %s493_s4 = inlined_call_operand.vmem [shape: f32[3,32], index: 4, kind: input, shape index: {}]   ;;  %s494_s5 = inlined_call_operand.vmem [shape: f32[8,2], index: 5, kind: output, shape index: {}]  }
   0x1   :  { %11 = vsyncpa [#allocation5], 0  ;;  %s416_s18 = smov [#allocation2]   ;;  %s368_s22 = scalar_lea.hbm %s491_s2, 512 }
   0x2   :  { %s21_s19 = sshll.u32 %s416_s18, 4  ;;  %p369_p0 = scmp.ne.s32.totalorder %s491_s2, %s368_s22  ;;  %s22_s19 = int_to_ptr.vmem [resolvable:$true] %s21_s19 }
   0x3   :  { %p372_p1 = scmp.lt.u32.totalorder %s368_s22, %s491_s2 }
   0x5   :  { %p374_p2 = pnand %p372_p1, %p369_p0 }
   0x7   :  { %377 = shalt.err (!%p374_p2)
}
   0x8   :  { %s378_s27 = scalar_lea.vmem %s22_s19, 512  ;;  %p383_p4 = scmp.lt.s32.totalorder %s22_s19, %s22_s19 }
   0x9   :  { %p379_p3 = scmp.ne.s32.totalorder %s22_s19, %s378_s27  ;;  %p384_p5 = scmp.lt.s32.totalorder %s378_s27, %s378_s27 }
   0xb   :  { %p385_p6 = por %p384_p5, %p383_p4 }
   0xd   :  { %p386_p7 = pnand %p385_p6, %p379_p3 }
   0xf   :  { %389 = shalt.err (!%p386_p7)
}
  0x10   :  { %s417_s28 = smov 128   ;;  %s418_s29 = smov 8  }
  0x11   :  { %27 = dma.hbm_to_vmem [thread:$0]  %s491_s2, 512, %s22_s19, [#allocation3], %s417_s28, %s417_s28, %s418_s29  }
  0x12   :  { %s419_s7 = smov [#allocation4]   ;;  %s390_s11 = scalar_lea.hbm %s492_s3, 512 }
  0x13   :  { %s33_s8 = sshll.u32 %s419_s7, 4  ;;  %p391_p8 = scmp.ne.s32.totalorder %s492_s3, %s390_s11  ;;  %s34_s8 = int_to_ptr.vmem [resolvable:$true] %s33_s8 }
  0x14   :  { %p394_p9 = scmp.lt.u32.totalorder %s390_s11, %s492_s3 }
  0x16   :  { %p396_p10 = pnand %p394_p9, %p391_p8 }
  0x18   :  { %399 = shalt.err (!%p396_p10)
}
  0x19   :  { %s400_s16 = scalar_lea.vmem %s34_s8, 512  ;;  %p405_p12 = scmp.lt.s32.totalorder %s34_s8, %s34_s8 }
  0x1a   :  { %p401_p11 = scmp.ne.s32.totalorder %s34_s8, %s400_s16  ;;  %p406_p13 = scmp.lt.s32.totalorder %s400_s16, %s400_s16 }
  0x1c   :  { %p407_p0 = por %p406_p13, %p405_p12 }
  0x1e   :  { %p408_p1 = pnand %p407_p0, %p401_p11 }
  0x20   :  { %411 = shalt.err (!%p408_p1)
}
  0x21   :  { %39 = dma.hbm_to_vmem [thread:$0]  %s492_s3, 512, %s34_s8, [#allocation5], %s417_s28, %s417_s28, %s418_s29  }
  0x22   :  { %412 = dma.done.wait [#allocation3], 512  }
  0x23   :  { %413 = vsyncadd [#allocation3], 4294966784 }
  0x24   :  { %414 = dma.done.wait [#allocation5], 512  }
  0x25   :  { %415 = vsyncadd [#allocation5], 4294966784  ;;  %v420_v0 = vmov 0.0   ;;  %vm421_vm0 = vmmov 0   ;;  %v422_v1 = vmov 0.0|0.0   ;;  %vm59_vm1 = vcmask 1043456  }
  0x26   :  { %322 = vmatprep.subr.mxu0 %v420_v0  ;;  %324 = vmatprep.mubr.msk.f32.mxu0 %vm421_vm0, %v420_v0  ;;  %vm55_vm2 = vcmask 31744   ;;  %v50_v2 = vld [vmem:[%s490_s1] sm:$0xf]  ;;  %v135_v5 = vld [vmem:[#allocation2 + $0x8] sm:$0xff]  ;;  %v136_v7 = vld [vmem:[#allocation2 + $0x10] sm:$0xff]  ;;  %v51_v13 = vlaneseq  ;;  %vm142_vm3 = vcmask 261120  }
  0x27   :  { %349 = vmatprep.subr.bf16.mxu1 %v422_v1  ;;  %335 = vmatprep.mubr.msk.f32.mxu1 %vm421_vm0, %v420_v0  ;;  %v49_v3 = vld [vmem:[%s489_s0] sm:$0xff]  ;;  %v137_v8 = vld [vmem:[#allocation2 + $0x18] sm:$0xff]  ;;  %v218_v11 = vld [vmem:[#allocation4 + $0x8] sm:$0xff]  ;;  %vm298_vm4 = vcmask 15360  }
  0x28   :  { %v134_v4 = vld [vmem:[#allocation2] sm:$0xff]  ;;  %323 = vmatpush3.msk.msra.mxu0 %vm59_vm1, %v50_v2  ;;  %v353_v9 = vpack.c.bf16 %v137_v8, %v136_v7  ;;  %v52_v14 = vshrl.u32 %v51_v13, 7  ;;  %v219_v22 = vld [vmem:[#allocation4 + $0x10] sm:$0xff]  ;;  %v220_v23 = vld [vmem:[#allocation4 + $0x18] sm:$0xff] }
  0x29   :  { %325 = vmatmul.mubr.msk.f32.vlgmr.msra.gmra.mrb[0].mxu0 %vm55_vm2, %v49_v3  ;;  %v350_v6 = vpack.c.bf16 %v135_v5, %v134_v4  ;;  %355 = vmatprep.subr.bf16.mxu0 %v422_v1  ;;  %v217_v10 = vld [vmem:[#allocation4] sm:$0xff]  ;;  %v359_v24 = vpack.c.bf16 %v220_v23, %v219_v22 }
  0x2a   :  { %346 = vmatprep.mubr.msk.f32.mxu0 %vm421_vm0, %v420_v0  ;;  %v356_v12 = vpack.c.bf16 %v218_v11, %v217_v10  ;;  %v53_v15 = vsub.s32 0, %v52_v14  ;;  %v48_v16 = vld [vmem:[%s493_s4] sm:$0x7]  ;;  %v140_v25 = vsub.s32 1, %v52_v14  ;;  %v223_v31 = vsub.s32 2, %v52_v14 }
  0x2b   :  { %351 = vmatpush3.bf16.msra.mxu1 %v350_v6 }
  0x2c   :  { %352 = vmatprep.subr.bf16.mxu1 %v422_v1  ;;  %357 = vmatpush3.bf16.msra.mxu0 %v356_v12  ;;  %v54_v17 = vrot.slane %v48_v16, %v53_v15  ;;  %v141_v26 = vrot.slane %v48_v16, %v140_v25  ;;  %v224_v32 = vrot.slane %v48_v16, %v223_v31 }
  0x2d   :  { %358 = vmatprep.subr.bf16.mxu0 %v422_v1 }
  0x2f   :  { %354 = vmatpush3.bf16.msra.mxu1 %v353_v9 }
  0x30   :  { %360 = vmatpush3.bf16.msra.mxu0 %v359_v24 }
  0xfc   :  { %v129_v18 = vpop.f32.mrb[0].mxu0 }
  0xfd   :  { %v130_v19 = vadd.f32 %v129_v18, %v54_v17  ;;  %v326_v20 = vpop.f32.mrb[1].mxu0 }
  0xff   :  { %v133_v21 = vmax.f32 %v130_v19, 0.0 }
 0x101   :  { %336 = vmatmul.mubr.msk.f32.vlgmr.msra.gmra.mrb[0].mxu1 %vm142_vm3, %v133_v21 }
 0x1d4   :  { %v212_v27 = vpop.f32.mrb[0].mxu1 }
 0x1d5   :  { %v213_v28 = vadd.f32 %v212_v27, %v141_v26  ;;  %v337_v29 = vpop.f32.mrb[1].mxu1 }
 0x1d7   :  { %v216_v30 = vmax.f32 %v213_v28, 0.0 }
 0x1d9   :  { %347 = vmatmul.mubr.msk.f32.vlgmr.msra.gmra.mrb[2].mxu0 %vm142_vm3, %v216_v30 }
 0x2ac   :  { %v294_v33 = vpop.f32.mrb[2].mxu0 }
 0x2ad   :  { %v295_v34 = vadd.f32 %v294_v33, %v224_v32  ;;  %v348_v35 = vpop.f32.mrb[3].mxu0 }
 0x2af   :  { %299 = vst.msk [vmem:[%s494_s5] sm:$0xff] %vm298_vm4, %v295_v34 }
 0x2b0   :  { %304 = vsyncpa [#allocation3], 1 }
 0x2b1   :  { %305 = vsyncpa [#allocation5], 1 }

</bundles_post_ra>
